<compile_context>
chip_gen: v7x
topology: tpu7x:2x2x1
jax: 0.10.0
libtpu: 0.0.40
codegen_flags: <defaults>
</compile_context>

<pallas_src>
import functools

import numpy as np

import jax
import jax.numpy as jnp
from jax.experimental import pallas as pl
from jax.experimental.pallas import tpu as pltpu

HX_SIZE = 32
HIDDEN1 = 128
_LANE = 128
_SUBLANE = 8
_MAX_BATCH_TILE = 2048


def _round_up(x, m):
    return (x + m - 1) // m * m


def _qnet_kernel(obs_ref, w1_ref, b1_ref, w2_ref, b2_ref, w3_ref, b3_ref,
                 q_ref, *, num_agents, n_obs, mm_dtype):
    # obs_ref: (TB, A * n_obs)            un-padded, lane slices per agent
    # w1_ref:  (A, n_obs, 128)   b1_ref:  (A, 1, 128)
    # w2_ref:  (A, 128, 32)      b2_ref:  (A, 1, 32)
    # w3_ref:  (A*32, qa_pad)    b3_ref:  (1, qa_pad)    (block-diag, zero-pad)
    # q_ref:   (TB, qa_pad)               single unmasked full-lane store
    h2s = []
    for a in range(num_agents):  # static unroll; num_agents is tiny (e.g. 3)
        x = obs_ref[:, a * n_obs:(a + 1) * n_obs]
        if x.dtype != mm_dtype:
            x = x.astype(mm_dtype)
        h1 = jnp.dot(x, w1_ref[a], preferred_element_type=jnp.float32)
        h1 = jnp.maximum(h1 + b1_ref[a], 0.0)                       # ReLU
        h2 = jnp.dot(h1.astype(mm_dtype), w2_ref[a],
                     preferred_element_type=jnp.float32)
        h2 = jnp.maximum(h2 + b2_ref[a], 0.0)                       # ReLU
        h2s.append(h2)
    # One block-diagonal layer-3 matmul packs every agent's q into one slab.
    h2_cat = jnp.concatenate(h2s, axis=-1).astype(mm_dtype)         # (TB, A*32)
    q = jnp.dot(h2_cat, w3_ref[...], preferred_element_type=jnp.float32)
    q_ref[...] = (q + b3_ref[...]).astype(q_ref.dtype)


def qnet_forward(obs, hidden, params, *, matmul_dtype=jnp.float32):
    """obs: (batch, num_agents, n_obs) f32; hidden: (batch, num_agents, 32) f32.

    Returns (q_values (batch, num_agents, n_actions), next_hidden).
    matmul_dtype=jnp.bfloat16 enables bf16 MXU operands (good on v6e/v7x);
    default f32 is exact and avoids bf16 VPU ops on v5e.
    """
    w1, b1, w2, b2, w3, b3 = (params[k] for k in ("w1", "b1", "w2", "b2", "w3", "b3"))
    batch, num_agents, n_obs = obs.shape
    n_act = w3.shape[-1]
    mm_dtype = np.dtype(matmul_dtype)

    qa = num_agents * n_act
    qa_pad = _round_up(qa, _LANE)
    b_pad = _round_up(batch, _SUBLANE)

    # >= 2 grid steps whenever the batch allows it (keeps both v7x TCs busy);
    # capped so the double-buffered working set stays small.
    tb = min(_MAX_BATCH_TILE, _round_up(pl.cdiv(b_pad, 2), _SUBLANE), b_pad)
    grid = (pl.cdiv(b_pad, tb),)

    # Plain reshape (no feature padding); only the batch rows are zero-padded
    # to a sublane multiple when needed (tiny, and often a no-op).
    obs2d = obs.reshape(batch, num_agents * n_obs)
    if mm_dtype != np.dtype(jnp.float32):
        obs2d = obs2d.astype(mm_dtype)
        w1 = w1.astype(mm_dtype)
        w2 = w2.astype(mm_dtype)
        w3 = w3.astype(mm_dtype)
    if b_pad != batch:
        obs2d = jnp.pad(obs2d, ((0, b_pad - batch), (0, 0)))

    # Block-diagonal layer-3 weight / concatenated bias (zero-padded to a
    # 128-lane multiple) -> one matmul emits the packed, lane-dense q slab.
    w3_bd = jax.scipy.linalg.block_diag(*[w3[a] for a in range(num_agents)])
    w3_bd = jnp.pad(w3_bd, ((0, 0), (0, qa_pad - qa)))
    b3_bd = jnp.pad(b3.reshape(1, qa), ((0, 0), (0, qa_pad - qa)))

    kernel = functools.partial(_qnet_kernel, num_agents=num_agents,
                               n_obs=n_obs, mm_dtype=mm_dtype)

    const3 = lambda i: (0, 0, 0)   # weights stay resident across batch tiles
    const2 = lambda i: (0, 0)

    in_itemsize = mm_dtype.itemsize
    flops = (2 * b_pad * num_agents * (n_obs * HIDDEN1 + HIDDEN1 * HX_SIZE)
             + 2 * b_pad * (num_agents * HX_SIZE) * qa_pad)
    bytes_accessed = (b_pad * num_agents * n_obs * in_itemsize        # obs read
                      + (w1.size + w2.size + w3_bd.size) * in_itemsize
                      + (b1.size + b2.size + b3_bd.size) * 4          # f32 biases
                      + b_pad * qa_pad * 4)                           # q write
    cost = pl.CostEstimate(flops=int(flops), transcendentals=0,
                           bytes_accessed=int(bytes_accessed))

    q2d = pl.pallas_call(
        kernel,
        out_shape=jax.ShapeDtypeStruct((b_pad, qa_pad), jnp.float32),
        grid_spec=pltpu.PrefetchScalarGridSpec(
            num_scalar_prefetch=0,
            grid=grid,
            in_specs=[
                pl.BlockSpec((tb, num_agents * n_obs), lambda i: (i, 0)),
                pl.BlockSpec((num_agents, n_obs, HIDDEN1), const3),
                pl.BlockSpec((num_agents, 1, HIDDEN1), const3),
                pl.BlockSpec((num_agents, HIDDEN1, HX_SIZE), const3),
                pl.BlockSpec((num_agents, 1, HX_SIZE), const3),
                pl.BlockSpec((num_agents * HX_SIZE, qa_pad), const2),
                pl.BlockSpec((1, qa_pad), const2),
            ],
            out_specs=pl.BlockSpec((tb, qa_pad), lambda i: (i, 0)),
        ),
        compiler_params=pltpu.CompilerParams(
            dimension_semantics=("parallel",)),
        cost_estimate=cost,
    )(obs2d, w1, b1, w2, b2, w3_bd, b3_bd)

    # Small slice of the packed slab (batch rows x A*n_act lanes), not a full
    # padded-slab round trip.
    q_values = q2d[:batch, :qa].reshape(batch, num_agents, n_act)

    # TODO(synk): recurrent=True GRUCell branch not implemented; with
    # recurrent=False PyTorch returns uninitialized next_hidden, so we pass the
    # incoming hidden through unchanged (no extra HBM allocation/write).
    return q_values, hidden


def init_params(key, num_agents, n_obs, n_act):
    """PyTorch-Linear-style uniform(-1/sqrt(fan_in), 1/sqrt(fan_in)) init."""
    def linear(key, fan_in, fan_out):
        kw, kb = jax.random.split(key)
        bound = 1.0 / jnp.sqrt(jnp.float32(fan_in))
        w = jax.random.uniform(kw, (num_agents, fan_in, fan_out),
                               jnp.float32, -bound, bound)
        b = jax.random.uniform(kb, (num_agents, 1, fan_out),
                               jnp.float32, -bound, bound)
        return w, b

    k1, k2, k3 = jax.random.split(key, 3)
    w1, b1 = linear(k1, n_obs, HIDDEN1)
    w2, b2 = linear(k2, HIDDEN1, HX_SIZE)
    w3, b3 = linear(k3, HX_SIZE, n_act)
    return {"w1": w1, "b1": b1, "w2": w2, "b2": b2, "w3": w3, "b3": b3}


def _reference_forward(obs, params):
    """Pure-JAX reference for the correctness sanity check."""
    w1, b1, w2, b2, w3, b3 = (params[k] for k in ("w1", "b1", "w2", "b2", "w3", "b3"))
    qs = []
    for a in range(obs.shape[1]):
        x = obs[:, a, :]
        h1 = jnp.maximum(x @ w1[a] + b1[a], 0.0)
        h2 = jnp.maximum(h1 @ w2[a] + b2[a], 0.0)
        qs.append(h2 @ w3[a] + b3[a])
    return jnp.stack(qs, axis=1)


if __name__ == "__main__":
    batch, num_agents, n_obs, n_act = 8, 3, 10, 5

    key = jax.random.PRNGKey(0)
    k_obs, k_params = jax.random.split(key)

    obs = jax.random.normal(k_obs, (batch, num_agents, n_obs), jnp.float32)
    hidden = jnp.zeros((batch, num_agents, HX_SIZE), jnp.float32)  # init_hidden
    params = init_params(k_params, num_agents, n_obs, n_act)

    q, next_hidden = jax.jit(qnet_forward)(obs, hidden, params)
    q = jax.block_until_ready(q)
    next_hidden = jax.block_until_ready(next_hidden)

    q_ref = _reference_forward(obs, params)
    assert q.shape == (batch, num_agents, n_act)
    assert next_hidden.shape == (batch, num_agents, HX_SIZE)
    assert jnp.allclose(q, q_ref, atol=1e-5, rtol=1e-5)

    print("KERNEL_OK")
</pallas_src>

<mosaic_0001>
module attributes {stable_mosaic.version = 11 : i64} {
  func.func @_qnet_kernel(%arg0: i32, %arg1: memref<8x30xf32, #tpu.memory_space<vmem>>, %arg2: memref<3x10x128xf32, #tpu.memory_space<vmem>>, %arg3: memref<3x1x128xf32, #tpu.memory_space<vmem>>, %arg4: memref<3x128x32xf32, #tpu.memory_space<vmem>>, %arg5: memref<3x1x32xf32, #tpu.memory_space<vmem>>, %arg6: memref<96x128xf32, #tpu.memory_space<vmem>>, %arg7: memref<1x128xf32, #tpu.memory_space<vmem>>, %arg8: memref<8x128xf32, #tpu.memory_space<vmem>>) attributes {dimension_semantics = [#tpu.dimension_semantics<parallel>], iteration_bounds = array<i64: 1>, scalar_prefetch = 0 : i64, scratch_operands = 0 : i64, tpu.core_type = #tpu.core_type<tc>, window_params = [{transform_indices = @transform_0, window_bounds = array<i64: 8, 30>}, {pipeline_mode = #tpu.pipeline_mode<synchronous>, transform_indices = @transform_1, window_bounds = array<i64: 3, 10, 128>}, {pipeline_mode = #tpu.pipeline_mode<synchronous>, transform_indices = @transform_2, window_bounds = array<i64: 3, 1, 128>}, {pipeline_mode = #tpu.pipeline_mode<synchronous>, transform_indices = @transform_3, window_bounds = array<i64: 3, 128, 32>}, {pipeline_mode = #tpu.pipeline_mode<synchronous>, transform_indices = @transform_4, window_bounds = array<i64: 3, 1, 32>}, {pipeline_mode = #tpu.pipeline_mode<synchronous>, transform_indices = @transform_5, window_bounds = array<i64: 96, 128>}, {pipeline_mode = #tpu.pipeline_mode<synchronous>, transform_indices = @transform_6, window_bounds = array<i64: 1, 128>}, {transform_indices = @transform_7, window_bounds = array<i64: 8, 128>}]} {
    %c0 = arith.constant 0 : index
    %c0_0 = arith.constant 0 : index
    %0 = vector.load %arg1[%c0, %c0_0] : memref<8x30xf32, #tpu.memory_space<vmem>>, vector<8x10xf32>
    %c0_1 = arith.constant 0 : index
    %c0_2 = arith.constant 0 : index
    %c0_3 = arith.constant 0 : index
    %1 = vector.load %arg2[%c0_1, %c0_2, %c0_3] : memref<3x10x128xf32, #tpu.memory_space<vmem>>, vector<1x10x128xf32>
    %2 = vector.shape_cast %1 : vector<1x10x128xf32> to vector<10x128xf32>
    %cst = arith.constant dense<0.000000e+00> : vector<8x128xf32>
    %3 = tpu.matmul %0, %2, %cst {dimension_numbers = #tpu.dot_dimension_numbers<[1], [0], [0], [1], [0, 0, 1, 1], [], []>} : vector<8x10xf32>, vector<10x128xf32>, vector<8x128xf32> -> vector<8x128xf32>
    %c0_4 = arith.constant 0 : index
    %c0_5 = arith.constant 0 : index
    %c0_6 = arith.constant 0 : index
    %4 = vector.load %arg3[%c0_4, %c0_5, %c0_6] : memref<3x1x128xf32, #tpu.memory_space<vmem>>, vector<1x1x128xf32>
    %5 = vector.shape_cast %4 : vector<1x1x128xf32> to vector<1x128xf32>
    %6 = vector.broadcast %5 : vector<1x128xf32> to vector<8x128xf32>
    %7 = arith.addf %3, %6 : vector<8x128xf32>
    %cst_7 = arith.constant 0.000000e+00 : f32
    %8 = vector.broadcast %cst_7 : f32 to vector<8x128xf32>
    %9 = arith.maximumf %7, %8 : vector<8x128xf32>
    %c0_8 = arith.constant 0 : index
    %c0_9 = arith.constant 0 : index
    %c0_10 = arith.constant 0 : index
    %10 = vector.load %arg4[%c0_8, %c0_9, %c0_10] : memref<3x128x32xf32, #tpu.memory_space<vmem>>, vector<1x128x32xf32>
    %11 = vector.shape_cast %10 : vector<1x128x32xf32> to vector<128x32xf32>
    %cst_11 = arith.constant dense<0.000000e+00> : vector<8x32xf32>
    %12 = tpu.matmul %9, %11, %cst_11 {dimension_numbers = #tpu.dot_dimension_numbers<[1], [0], [0], [1], [0, 0, 1, 1], [], []>} : vector<8x128xf32>, vector<128x32xf32>, vector<8x32xf32> -> vector<8x32xf32>
    %c0_12 = arith.constant 0 : index
    %c0_13 = arith.constant 0 : index
    %c0_14 = arith.constant 0 : index
    %13 = vector.load %arg5[%c0_12, %c0_13, %c0_14] : memref<3x1x32xf32, #tpu.memory_space<vmem>>, vector<1x1x32xf32>
    %14 = vector.shape_cast %13 : vector<1x1x32xf32> to vector<1x32xf32>
    %15 = vector.broadcast %14 : vector<1x32xf32> to vector<8x32xf32>
    %16 = arith.addf %12, %15 : vector<8x32xf32>
    %cst_15 = arith.constant 0.000000e+00 : f32
    %17 = vector.broadcast %cst_15 : f32 to vector<8x32xf32>
    %18 = arith.maximumf %16, %17 : vector<8x32xf32>
    %c0_16 = arith.constant 0 : index
    %c10 = arith.constant 10 : index
    %19 = vector.load %arg1[%c0_16, %c10] : memref<8x30xf32, #tpu.memory_space<vmem>>, vector<8x10xf32>
    %c1 = arith.constant 1 : index
    %c0_17 = arith.constant 0 : index
    %c0_18 = arith.constant 0 : index
    %20 = vector.load %arg2[%c1, %c0_17, %c0_18] : memref<3x10x128xf32, #tpu.memory_space<vmem>>, vector<1x10x128xf32>
    %21 = vector.shape_cast %20 : vector<1x10x128xf32> to vector<10x128xf32>
    %cst_19 = arith.constant dense<0.000000e+00> : vector<8x128xf32>
    %22 = tpu.matmul %19, %21, %cst_19 {dimension_numbers = #tpu.dot_dimension_numbers<[1], [0], [0], [1], [0, 0, 1, 1], [], []>} : vector<8x10xf32>, vector<10x128xf32>, vector<8x128xf32> -> vector<8x128xf32>
    %c1_20 = arith.constant 1 : index
    %c0_21 = arith.constant 0 : index
    %c0_22 = arith.constant 0 : index
    %23 = vector.load %arg3[%c1_20, %c0_21, %c0_22] : memref<3x1x128xf32, #tpu.memory_space<vmem>>, vector<1x1x128xf32>
    %24 = vector.shape_cast %23 : vector<1x1x128xf32> to vector<1x128xf32>
    %25 = vector.broadcast %24 : vector<1x128xf32> to vector<8x128xf32>
    %26 = arith.addf %22, %25 : vector<8x128xf32>
    %cst_23 = arith.constant 0.000000e+00 : f32
    %27 = vector.broadcast %cst_23 : f32 to vector<8x128xf32>
    %28 = arith.maximumf %26, %27 : vector<8x128xf32>
    %c1_24 = arith.constant 1 : index
    %c0_25 = arith.constant 0 : index
    %c0_26 = arith.constant 0 : index
    %29 = vector.load %arg4[%c1_24, %c0_25, %c0_26] : memref<3x128x32xf32, #tpu.memory_space<vmem>>, vector<1x128x32xf32>
    %30 = vector.shape_cast %29 : vector<1x128x32xf32> to vector<128x32xf32>
    %cst_27 = arith.constant dense<0.000000e+00> : vector<8x32xf32>
    %31 = tpu.matmul %28, %30, %cst_27 {dimension_numbers = #tpu.dot_dimension_numbers<[1], [0], [0], [1], [0, 0, 1, 1], [], []>} : vector<8x128xf32>, vector<128x32xf32>, vector<8x32xf32> -> vector<8x32xf32>
    %c1_28 = arith.constant 1 : index
    %c0_29 = arith.constant 0 : index
    %c0_30 = arith.constant 0 : index
    %32 = vector.load %arg5[%c1_28, %c0_29, %c0_30] : memref<3x1x32xf32, #tpu.memory_space<vmem>>, vector<1x1x32xf32>
    %33 = vector.shape_cast %32 : vector<1x1x32xf32> to vector<1x32xf32>
    %34 = vector.broadcast %33 : vector<1x32xf32> to vector<8x32xf32>
    %35 = arith.addf %31, %34 : vector<8x32xf32>
    %cst_31 = arith.constant 0.000000e+00 : f32
    %36 = vector.broadcast %cst_31 : f32 to vector<8x32xf32>
    %37 = arith.maximumf %35, %36 : vector<8x32xf32>
    %c0_32 = arith.constant 0 : index
    %c20 = arith.constant 20 : index
    %38 = vector.load %arg1[%c0_32, %c20] : memref<8x30xf32, #tpu.memory_space<vmem>>, vector<8x10xf32>
    %c2 = arith.constant 2 : index
    %c0_33 = arith.constant 0 : index
    %c0_34 = arith.constant 0 : index
    %39 = vector.load %arg2[%c2, %c0_33, %c0_34] : memref<3x10x128xf32, #tpu.memory_space<vmem>>, vector<1x10x128xf32>
    %40 = vector.shape_cast %39 : vector<1x10x128xf32> to vector<10x128xf32>
    %cst_35 = arith.constant dense<0.000000e+00> : vector<8x128xf32>
    %41 = tpu.matmul %38, %40, %cst_35 {dimension_numbers = #tpu.dot_dimension_numbers<[1], [0], [0], [1], [0, 0, 1, 1], [], []>} : vector<8x10xf32>, vector<10x128xf32>, vector<8x128xf32> -> vector<8x128xf32>
    %c2_36 = arith.constant 2 : index
    %c0_37 = arith.constant 0 : index
    %c0_38 = arith.constant 0 : index
    %42 = vector.load %arg3[%c2_36, %c0_37, %c0_38] : memref<3x1x128xf32, #tpu.memory_space<vmem>>, vector<1x1x128xf32>
    %43 = vector.shape_cast %42 : vector<1x1x128xf32> to vector<1x128xf32>
    %44 = vector.broadcast %43 : vector<1x128xf32> to vector<8x128xf32>
    %45 = arith.addf %41, %44 : vector<8x128xf32>
    %cst_39 = arith.constant 0.000000e+00 : f32
    %46 = vector.broadcast %cst_39 : f32 to vector<8x128xf32>
    %47 = arith.maximumf %45, %46 : vector<8x128xf32>
    %c2_40 = arith.constant 2 : index
    %c0_41 = arith.constant 0 : index
    %c0_42 = arith.constant 0 : index
    %48 = vector.load %arg4[%c2_40, %c0_41, %c0_42] : memref<3x128x32xf32, #tpu.memory_space<vmem>>, vector<1x128x32xf32>
    %49 = vector.shape_cast %48 : vector<1x128x32xf32> to vector<128x32xf32>
    %cst_43 = arith.constant dense<0.000000e+00> : vector<8x32xf32>
    %50 = tpu.matmul %47, %49, %cst_43 {dimension_numbers = #tpu.dot_dimension_numbers<[1], [0], [0], [1], [0, 0, 1, 1], [], []>} : vector<8x128xf32>, vector<128x32xf32>, vector<8x32xf32> -> vector<8x32xf32>
    %c2_44 = arith.constant 2 : index
    %c0_45 = arith.constant 0 : index
    %c0_46 = arith.constant 0 : index
    %51 = vector.load %arg5[%c2_44, %c0_45, %c0_46] : memref<3x1x32xf32, #tpu.memory_space<vmem>>, vector<1x1x32xf32>
    %52 = vector.shape_cast %51 : vector<1x1x32xf32> to vector<1x32xf32>
    %53 = vector.broadcast %52 : vector<1x32xf32> to vector<8x32xf32>
    %54 = arith.addf %50, %53 : vector<8x32xf32>
    %cst_47 = arith.constant 0.000000e+00 : f32
    %55 = vector.broadcast %cst_47 : f32 to vector<8x32xf32>
    %56 = arith.maximumf %54, %55 : vector<8x32xf32>
    %57 = tpu.concatenate %18, %37, %56 in 1 : vector<8x32xf32>, vector<8x32xf32>, vector<8x32xf32> -> vector<8x96xf32>
    %c0_48 = arith.constant 0 : index
    %c0_49 = arith.constant 0 : index
    %58 = vector.load %arg6[%c0_48, %c0_49] : memref<96x128xf32, #tpu.memory_space<vmem>>, vector<96x128xf32>
    %cst_50 = arith.constant dense<0.000000e+00> : vector<8x128xf32>
    %59 = tpu.matmul %57, %58, %cst_50 {dimension_numbers = #tpu.dot_dimension_numbers<[1], [0], [0], [1], [0, 0, 1, 1], [], []>} : vector<8x96xf32>, vector<96x128xf32>, vector<8x128xf32> -> vector<8x128xf32>
    %c0_51 = arith.constant 0 : index
    %c0_52 = arith.constant 0 : index
    %60 = vector.load %arg7[%c0_51, %c0_52] : memref<1x128xf32, #tpu.memory_space<vmem>>, vector<1x128xf32>
    %61 = vector.broadcast %60 : vector<1x128xf32> to vector<8x128xf32>
    %62 = arith.addf %59, %61 : vector<8x128xf32>
    %c0_53 = arith.constant 0 : index
    %c0_54 = arith.constant 0 : index
    %63 = vector.load %arg8[%c0_53, %c0_54] : memref<8x128xf32, #tpu.memory_space<vmem>>, vector<8x128xf32>
    tpu.vector_store %arg8[%c0_53, %c0_54], %62 {strides = array<i32>} : memref<8x128xf32, #tpu.memory_space<vmem>>, vector<8x128xf32>,
    return
  }
  func.func @transform_0(%arg0: i32) -> (i32, i32) {
    %c0_i32 = arith.constant 0 : i32
    %c0_i32_0 = arith.constant 0 : i32
    return %arg0, %c0_i32 : i32, i32
  }
  func.func @transform_1(%arg0: i32) -> (i32, i32, i32) {
    %c0_i32 = arith.constant 0 : i32
    %c0_i32_0 = arith.constant 0 : i32
    %c0_i32_1 = arith.constant 0 : i32
    %c0_i32_2 = arith.constant 0 : i32
    return %c0_i32, %c0_i32_0, %c0_i32_1 : i32, i32, i32
  }
  func.func @transform_2(%arg0: i32) -> (i32, i32, i32) {
    %c0_i32 = arith.constant 0 : i32
    %c0_i32_0 = arith.constant 0 : i32
    %c0_i32_1 = arith.constant 0 : i32
    %c0_i32_2 = arith.constant 0 : i32
    return %c0_i32, %c0_i32_0, %c0_i32_1 : i32, i32, i32
  }
  func.func @transform_3(%arg0: i32) -> (i32, i32, i32) {
    %c0_i32 = arith.constant 0 : i32
    %c0_i32_0 = arith.constant 0 : i32
    %c0_i32_1 = arith.constant 0 : i32
    %c0_i32_2 = arith.constant 0 : i32
    return %c0_i32, %c0_i32_0, %c0_i32_1 : i32, i32, i32
  }
  func.func @transform_4(%arg0: i32) -> (i32, i32, i32) {
    %c0_i32 = arith.constant 0 : i32
    %c0_i32_0 = arith.constant 0 : i32
    %c0_i32_1 = arith.constant 0 : i32
    %c0_i32_2 = arith.constant 0 : i32
    return %c0_i32, %c0_i32_0, %c0_i32_1 : i32, i32, i32
  }
  func.func @transform_5(%arg0: i32) -> (i32, i32) {
    %c0_i32 = arith.constant 0 : i32
    %c0_i32_0 = arith.constant 0 : i32
    %c0_i32_1 = arith.constant 0 : i32
    return %c0_i32, %c0_i32_0 : i32, i32
  }
  func.func @transform_6(%arg0: i32) -> (i32, i32) {
    %c0_i32 = arith.constant 0 : i32
    %c0_i32_0 = arith.constant 0 : i32
    %c0_i32_1 = arith.constant 0 : i32
    return %c0_i32, %c0_i32_0 : i32, i32
  }
  func.func @transform_7(%arg0: i32) -> (i32, i32) {
    %c0_i32 = arith.constant 0 : i32
    %c0_i32_0 = arith.constant 0 : i32
    return %arg0, %c0_i32 : i32, i32
  }
}

</mosaic_0001>

<bundles_post_ra>
// kernel: qnet_forward.1
= control target key start
LH: loop header
LB: loop body
LE: loop exit
PB: predicated region body
PF: predicated region fallthrough
CT: control target
= control target key end

     0   :  { %vm40_vm0 = vcmask 1041408   ;;  %v1079_v1 = vmov 0.0|0.0   ;;  %s1080_s30 = smov 118   ;;  %vm1081_vm1 = vmmov 1   ;;  %vm1082_vm3 = vmmov 0   ;;  %s1084_s19 = smov 108   ;;  %s1412_s0 = inlined_call_operand.vmem [shape: f32[8,30], index: 0, kind: input, shape index: {}]   ;;  %s1413_s1 = inlined_call_operand.vmem [shape: f32[3,10,128], index: 1, kind: input, shape index: {}]   ;;  %s1414_s3 = inlined_call_operand.vmem [shape: f32[3,128,32], index: 3, kind: input, shape index: {}]   ;;  %s1415_s2 = inlined_call_operand.vmem [shape: f32[3,1,128], index: 2, kind: input, shape index: {}]   ;;  %s1416_s5 = inlined_call_operand.vmem [shape: f32[96,128], index: 5, kind: input, shape index: {}]   ;;  %s1417_s4 = inlined_call_operand.vmem [shape: f32[3,1,32], index: 4, kind: input, shape index: {}]   ;;  %s1418_s6 = inlined_call_operand.vmem [shape: f32[1,128], index: 6, kind: input, shape index: {}]   ;;  %s1419_s7 = inlined_call_operand.vmem [shape: f32[8,128], index: 7, kind: output, shape index: {}]  }
   0x1   :  { %v26_v0 = vld [vmem:[%s1412_s0] sm:$0xff]  ;;  %969 = vmatprep.subr.bf16.mxu0 %v1079_v1  ;;  %v28_v3 = vld [vmem:[%s1413_s1 + $0x8] sm:$0x3]  ;;  %973 = vmatprep.subr.bf16.mxu1 %v1079_v1  ;;  %vm1138_vm2 = vmpackc.low %vm40_vm0, %vm1081_vm1  ;;  %v1083_v6 = vmov 0.0   ;;  %vm36_vm4 = vcmask 80896   ;;  %s1085_s12 = smov 32  }
   0x2   :  { %v27_v2 = vld [vmem:[%s1413_s1] sm:$0xff]  ;;  %220 = vrot.lane.b32.xlu0 %v26_v0, %s1080_s30  ;;  %820 = vmatprep.mubr.msk.f32.mxu0 %vm1082_vm3, %v1083_v6  ;;  %v693_v7 = vld [vmem:[%s1413_s1 + $0x10] sm:$0xff]  ;;  %v694_v8 = vld [vmem:[%s1413_s1 + $0x18] sm:$0x3]  ;;  %s1086_s21 = smov 64   ;;  %vm587_vm5 = vcmask 261120  }
   0x3   :  { %v970_v4 = vpack.c.bf16 %v28_v3, %v27_v2  ;;  %v115_v9 = vld [vmem:[%s1414_s3] sm:$0xff]  ;;  %v116_v10 = vld [vmem:[%s1414_s3 + $0x8] sm:$0xff]  ;;  %v117_v11 = vld [vmem:[%s1414_s3 + $0x10] sm:$0xff]  ;;  %855 = vmatprep.mubr.msk.f32.mxu1 %vm1082_vm3, %v1083_v6  ;;  %v998_v12 = vpack.c.bf16 %v694_v8, %v693_v7  ;;  %vm589_vm6 = vcmask 523264   ;;  %vm610_vm7 = vcmask 785408  }
   0x4   :  { %v974_v13 = vpack.c.bf16 %v116_v10, %v115_v9  ;;  %v118_v14 = vld [vmem:[%s1414_s3 + $0x18] sm:$0xff]  ;;  %v119_v16 = vld [vmem:[%s1414_s3 + $0x20] sm:$0xff]  ;;  %v120_v17 = vld [vmem:[%s1414_s3 + $0x28] sm:$0xff] }
   0x5   :  { %972 = vmatpush3.bf16.msk.msra.mxu0 %vm1138_vm2, %v970_v4  ;;  %v977_v15 = vpack.c.bf16 %v118_v14, %v117_v11  ;;  %v980_v18 = vpack.c.bf16 %v120_v17, %v119_v16  ;;  %v121_v19 = vld [vmem:[%s1414_s3 + $0x30] sm:$0xff]  ;;  %v122_v20 = vld [vmem:[%s1414_s3 + $0x38] sm:$0xff]  ;;  %v123_v22 = vld [vmem:[%s1414_s3 + $0x40] sm:$0xff] }
   0x6   :  { %997 = vmatprep.subr.bf16.mxu0 %v1079_v1  ;;  %405 = vrot.lane.b32.xlu0 %v26_v0, %s1084_s19  ;;  %v983_v21 = vpack.c.bf16 %v122_v20, %v121_v19  ;;  %v124_v23 = vld [vmem:[%s1414_s3 + $0x48] sm:$0xff]  ;;  %v125_v25 = vld [vmem:[%s1414_s3 + $0x50] sm:$0xff]  ;;  %v126_v26 = vld [vmem:[%s1414_s3 + $0x58] sm:$0xff] }
   0x7   :  { %975 = vmatpush3.bf16.msra.mxu1 %v974_v13  ;;  %v986_v24 = vpack.c.bf16 %v124_v23, %v123_v22  ;;  %v989_v27 = vpack.c.bf16 %v126_v26, %v125_v25  ;;  %v127_v28 = vld [vmem:[%s1414_s3 + $0x60] sm:$0xff]  ;;  %v128_v29 = vld [vmem:[%s1414_s3 + $0x68] sm:$0xff]  ;;  %v129_v31 = vld [vmem:[%s1414_s3 + $0x70] sm:$0xff] }
   0x8   :  { %821 = vmatmul.mubr.msk.f32.vlgmr.msra.gmra.mrb[0].mxu0 %vm36_vm4, %v26_v0  ;;  %976 = vmatprep.subr.bf16.mxu1 %v1079_v1  ;;  %v992_v30 = vpack.c.bf16 %v128_v29, %v127_v28  ;;  %v130_v32 = vld [vmem:[%s1414_s3 + $0x78] sm:$0xff]  ;;  %v699_v34 = vld [vmem:[%s1414_s3 + $0x80] sm:$0xff]  ;;  %v700_v35 = vld [vmem:[%s1414_s3 + $0x88] sm:$0xff] }
   0x9   :  { %1000 = vmatpush3.bf16.msk.msra.mxu0 %vm1138_vm2, %v998_v12  ;;  %862 = vmatprep.mubr.msk.f32.mxu0 %vm1082_vm3, %v1083_v6  ;;  %v995_v33 = vpack.c.bf16 %v130_v32, %v129_v31  ;;  %v1002_v36 = vpack.c.bf16 %v700_v35, %v699_v34  ;;  %v701_v37 = vld [vmem:[%s1414_s3 + $0x90] sm:$0xff]  ;;  %v702_v38 = vld [vmem:[%s1414_s3 + $0x98] sm:$0xff]  ;;  %v703_v41 = vld [vmem:[%s1414_s3 + $0xa0] sm:$0xff] }
   0xa   :  { %1001 = vmatprep.subr.bf16.mxu0 %v1079_v1  ;;  %v1005_v40 = vpack.c.bf16 %v702_v38, %v701_v37  ;;  %v704_v42 = vld [vmem:[%s1414_s3 + $0xa8] sm:$0xff]  ;;  %v705_v44 = vld [vmem:[%s1414_s3 + $0xb0] sm:$0xff]  ;;  %v706_v45 = vld [vmem:[%s1414_s3 + $0xb8] sm:$0xff] }
   0xb   :  { %978 = vmatpush3.bf16.msra.mxu1 %v977_v15  ;;  %v1008_v43 = vpack.c.bf16 %v704_v42, %v703_v41  ;;  %v1011_v46 = vpack.c.bf16 %v706_v45, %v705_v44  ;;  %v707_v47 = vld [vmem:[%s1414_s3 + $0xc0] sm:$0xff]  ;;  %v708_v48 = vld [vmem:[%s1414_s3 + $0xc8] sm:$0xff]  ;;  %v709_v50 = vld [vmem:[%s1414_s3 + $0xd0] sm:$0xff] }
   0xc   :  { %979 = vmatprep.subr.bf16.mxu1 %v1079_v1  ;;  %v1014_v49 = vpack.c.bf16 %v708_v48, %v707_v47  ;;  %v710_v51 = vld [vmem:[%s1414_s3 + $0xd8] sm:$0xff]  ;;  %v711_v53 = vld [vmem:[%s1414_s3 + $0xe0] sm:$0xff]  ;;  %v712_v54 = vld [vmem:[%s1414_s3 + $0xe8] sm:$0xff] }
   0xd   :  { %v1017_v52 = vpack.c.bf16 %v710_v51, %v709_v50  ;;  %v1020_v55 = vpack.c.bf16 %v712_v54, %v711_v53  ;;  %v713_v56 = vld [vmem:[%s1414_s3 + $0xf0] sm:$0xff]  ;;  %v714_v57 = vld [vmem:[%s1414_s3 + $0xf8] sm:$0xff]  ;;  %v689_v59 = vld [vmem:[%s1415_s2] ss:$0 sm:$0xff] }
   0xe   :  { %v1023_v58 = vpack.c.bf16 %v714_v57, %v713_v56  ;;  %v717_v60 = vld [vmem:[%s1413_s1 + $0x20] sm:$0xff]  ;;  %v718_v61 = vld [vmem:[%s1413_s1 + $0x28] sm:$0x3]  ;;  %v725_v10 = vld [vmem:[%s1414_s3 + $0x110] sm:$0xff] }
   0xf   :  { %981 = vmatpush3.bf16.msra.mxu1 %v980_v18  ;;  %v1026_v2 = vpack.c.bf16 %v718_v61, %v717_v60  ;;  %v723_v4 = vld [vmem:[%s1414_s3 + $0x100] sm:$0xff]  ;;  %v724_v7 = vld [vmem:[%s1414_s3 + $0x108] sm:$0xff]  ;;  %v726_v11 = vld [vmem:[%s1414_s3 + $0x118] sm:$0xff] }
  0x10   :  { %982 = vmatprep.subr.bf16.mxu1 %v1079_v1  ;;  %v1030_v9 = vpack.c.bf16 %v724_v7, %v723_v4  ;;  %v1033_v5 = vpack.c.bf16 %v726_v11, %v725_v10  ;;  %v727_v12 = vld [vmem:[%s1414_s3 + $0x120] sm:$0xff]  ;;  %v728_v13 = vld [vmem:[%s1414_s3 + $0x128] sm:$0xff]  ;;  %v729_v15 = vld [vmem:[%s1414_s3 + $0x130] sm:$0xff] }
  0x11   :  { %v1036_v14 = vpack.c.bf16 %v728_v13, %v727_v12  ;;  %v730_v16 = vld [vmem:[%s1414_s3 + $0x138] sm:$0xff]  ;;  %v731_v18 = vld [vmem:[%s1414_s3 + $0x140] sm:$0xff]  ;;  %v732_v19 = vld [vmem:[%s1414_s3 + $0x148] sm:$0xff] }
  0x12   :  { %v1039_v17 = vpack.c.bf16 %v730_v16, %v729_v15  ;;  %v1042_v20 = vpack.c.bf16 %v732_v19, %v731_v18  ;;  %v734_v22 = vld [vmem:[%s1414_s3 + $0x158] sm:$0xff]  ;;  %v736_v25 = vld [vmem:[%s1414_s3 + $0x168] sm:$0xff]  ;;  %v720_v37 = vld [vmem:[%s1415_s2 + $0x2] ss:$0 sm:$0xff] }
  0x13   :  { %984 = vmatpush3.bf16.msra.mxu1 %v983_v21  ;;  %v733_v21 = vld [vmem:[%s1414_s3 + $0x150] sm:$0xff]  ;;  %v738_v28 = vld [vmem:[%s1414_s3 + $0x178] sm:$0xff]  ;;  %v591_v42 = vld [vmem:[%s1416_s5] sm:$0xff] }
  0x14   :  { %985 = vmatprep.subr.bf16.mxu1 %v1079_v1  ;;  %v1045_v23 = vpack.c.bf16 %v734_v22, %v733_v21  ;;  %v594_v45 = vld [vmem:[%s1416_s5 + $0x18] sm:$0xff]  ;;  %v595_v47 = vld [vmem:[%s1416_s5 + $0x20] sm:$0xff]  ;;  %v596_v48 = vld [vmem:[%s1416_s5 + $0x28] sm:$0xff] }
  0x15   :  { %v1060_v51 = vpack.c.bf16 %v596_v48, %v595_v47  ;;  %v597_v54 = vld [vmem:[%s1416_s5 + $0x30] sm:$0xff]  ;;  %v741_v13 = vld [vmem:[%s1418_s6] ss:$0 sm:$0xff] }
  0x16   :  { %v601_v61 = vld [vmem:[%s1416_s5 + $0x50] sm:$0xff] }
  0x17   :  { %987 = vmatpush3.bf16.msra.mxu1 %v986_v24  ;;  %v735_v24 = vld [vmem:[%s1414_s3 + $0x160] sm:$0xff] }
  0x18   :  { %988 = vmatprep.subr.bf16.mxu1 %v1079_v1  ;;  %v1048_v26 = vpack.c.bf16 %v736_v25, %v735_v24 }
  0x1b   :  { %990 = vmatpush3.bf16.msra.mxu1 %v989_v27  ;;  %v737_v27 = vld [vmem:[%s1414_s3 + $0x170] sm:$0xff] }
  0x1c   :  { %991 = vmatprep.subr.bf16.mxu1 %v1079_v1  ;;  %v1051_v29 = vpack.c.bf16 %v738_v28, %v737_v27 }
  0x1f   :  { %993 = vmatpush3.bf16.msra.mxu1 %v992_v30  ;;  %v696_v30 = vld [vmem:[%s1415_s2 + $0x1] ss:$0 sm:$0xff] }
  0x20   :  { %994 = vmatprep.subr.bf16.mxu1 %v1079_v1 }
  0x23   :  { %996 = vmatpush3.bf16.msra.mxu1 %v995_v33 }
  0x24   :  { %1025 = vmatprep.subr.bf16.mxu1 %v1079_v1 }
  0x74   :  { %v221_v39 = vpop.permute.xlu0 %220 }
  0x75   :  { %863 = vmatmul.mubr.msk.f32.vlgmr.msra.gmra.mrb[2].mxu0 %vm36_vm4, %v221_v39 }
  0x76   :  { %1003 = vmatpush3.bf16.msra.mxu0 %v1002_v36  ;;  %897 = vmatprep.mubr.msk.f32.mxu0 %vm1082_vm3, %v1083_v6 }
  0x77   :  { %1004 = vmatprep.subr.bf16.mxu0 %v1079_v1 }
  0x78   :  { %v406_v8 = vpop.permute.xlu0 %405 }
  0x7a   :  { %1006 = vmatpush3.bf16.msra.mxu0 %v1005_v40 }
  0x7b   :  { %1007 = vmatprep.subr.bf16.mxu0 %v1079_v1 }
  0x7e   :  { %1009 = vmatpush3.bf16.msra.mxu0 %v1008_v43  ;;  %v592_v43 = vld [vmem:[%s1416_s5 + $0x8] sm:$0xff] }
  0x7f   :  { %1010 = vmatprep.subr.bf16.mxu0 %v1079_v1  ;;  %v1054_v44 = vpack.c.bf16 %v592_v43, %v591_v42 }
  0x82   :  { %1012 = vmatpush3.bf16.msra.mxu0 %v1011_v46 }
  0x83   :  { %1013 = vmatprep.subr.bf16.mxu0 %v1079_v1 }
  0x86   :  { %1015 = vmatpush3.bf16.msra.mxu0 %v1014_v49  ;;  %v716_v49 = vld [vmem:[%s1417_s4 + $0x1] ss:$0 sm:$0xff] }
  0x87   :  { %1016 = vmatprep.subr.bf16.mxu0 %v1079_v1 }
  0x8a   :  { %1018 = vmatpush3.bf16.msra.mxu0 %v1017_v52 }
  0x8b   :  { %1019 = vmatprep.subr.bf16.mxu0 %v1079_v1 }
  0x8e   :  { %1021 = vmatpush3.bf16.msra.mxu0 %v1020_v55  ;;  %v598_v55 = vld [vmem:[%s1416_s5 + $0x38] sm:$0xff] }
  0x8f   :  { %1022 = vmatprep.subr.bf16.mxu0 %v1079_v1  ;;  %v1063_v57 = vpack.c.bf16 %v598_v55, %v597_v54 }
  0x92   :  { %1024 = vmatpush3.bf16.msra.mxu0 %v1023_v58  ;;  %v599_v58 = vld [vmem:[%s1416_s5 + $0x40] sm:$0xff] }
  0x93   :  { %1053 = vmatprep.subr.bf16.mxu0 %v1079_v1 }
  0xdb   :  { %v110_v62 = vpop.f32.mrb[0].mxu0 }
  0xdc   :  { %v111_v63 = vadd.f32 %v689_v59, %v110_v62  ;;  %v822_v0 = vpop.f32.mrb[1].mxu0  ;;  %v600_v59 = vld [vmem:[%s1416_s5 + $0x48] sm:$0xff]  ;;  %v602_v62 = vld [vmem:[%s1416_s5 + $0x58] sm:$0xff] }
  0xdd   :  { %v1066_v60 = vpack.c.bf16 %v600_v59, %v599_v58  ;;  %v740_v0 = vld [vmem:[%s1417_s4 + $0x2] ss:$0 sm:$0xff] }
  0xde   :  { %v114_v3 = vmax.f32 %v111_v63, 0.0  ;;  %v1069_v63 = vpack.c.bf16 %v602_v62, %v601_v61 }
  0xe0   :  { %856 = vmatmul.mubr.f32.vlgmr.msra.gmra.mrb[0].mxu1 %v114_v3 }
  0xe1   :  { %1028 = vmatpush3.bf16.msk.msra.mxu1 %vm1138_vm2, %v1026_v2  ;;  %904 = vmatprep.mubr.msk.f32.mxu1 %vm1082_vm3, %v1083_v6 }
  0xe2   :  { %1029 = vmatprep.subr.bf16.mxu1 %v1079_v1 }
  0xe4   :  { %905 = vmatmul.mubr.msk.f32.vlgmr.msra.gmra.mrb[2].mxu1 %vm36_vm4, %v406_v8  ;;  %v692_v8 = vld [vmem:[%s1417_s4] ss:$0 sm:$0xff] }
  0xe5   :  { %1031 = vmatpush3.bf16.msra.mxu1 %v1030_v9  ;;  %939 = vmatprep.mubr.msk.f32.mxu1 %vm1082_vm3, %v1083_v6 }
  0xe6   :  { %1032 = vmatprep.subr.bf16.mxu1 %v1079_v1 }
  0xe9   :  { %1034 = vmatpush3.bf16.msra.mxu1 %v1033_v5 }
  0xea   :  { %1035 = vmatprep.subr.bf16.mxu1 %v1079_v1 }
  0xed   :  { %1037 = vmatpush3.bf16.msra.mxu1 %v1036_v14 }
  0xee   :  { %1038 = vmatprep.subr.bf16.mxu1 %v1079_v1 }
  0xf1   :  { %1040 = vmatpush3.bf16.msra.mxu1 %v1039_v17 }
  0xf2   :  { %1041 = vmatprep.subr.bf16.mxu1 %v1079_v1 }
  0xf5   :  { %1043 = vmatpush3.bf16.msra.mxu1 %v1042_v20 }
  0xf6   :  { %1044 = vmatprep.subr.bf16.mxu1 %v1079_v1 }
  0xf9   :  { %1046 = vmatpush3.bf16.msra.mxu1 %v1045_v23 }
  0xfa   :  { %1047 = vmatprep.subr.bf16.mxu1 %v1079_v1 }
  0xfd   :  { %1049 = vmatpush3.bf16.msra.mxu1 %v1048_v26 }
  0xfe   :  { %1050 = vmatprep.subr.bf16.mxu1 %v1079_v1 }
 0x101   :  { %1052 = vmatpush3.bf16.msra.mxu1 %v1051_v29 }
 0x148   :  { %v293_v31 = vpop.f32.mrb[2].mxu0 }
 0x149   :  { %v294_v32 = vadd.f32 %v696_v30, %v293_v31  ;;  %v864_v33 = vpop.f32.mrb[3].mxu0 }
 0x14b   :  { %v297_v34 = vmax.f32 %v294_v32, 0.0 }
 0x14d   :  { %898 = vmatmul.mubr.f32.vlgmr.msra.gmra.mrb[4].mxu0 %v297_v34 }
 0x14e   :  { %966 = vmatprep.mubr.msk.f32.mxu0 %vm1082_vm3, %v1083_v6  ;;  %v593_v6 = vld [vmem:[%s1416_s5 + $0x10] sm:$0xff]  ;;  %1055 = vmatpush3.bf16.msra.mxu0 %v1054_v44 }
 0x14f   :  { %v1057_v46 = vpack.c.bf16 %v594_v45, %v593_v6  ;;  %1056 = vmatprep.subr.bf16.mxu0 %v1079_v1 }
 0x152   :  { %1058 = vmatpush3.bf16.msra.mxu0 %v1057_v46 }
 0x153   :  { %1059 = vmatprep.subr.bf16.mxu0 %v1079_v1 }
 0x156   :  { %1061 = vmatpush3.bf16.msra.mxu0 %v1060_v51 }
 0x157   :  { %1062 = vmatprep.subr.bf16.mxu0 %v1079_v1 }
 0x15a   :  { %1064 = vmatpush3.bf16.msra.mxu0 %v1063_v57 }
 0x15b   :  { %1065 = vmatprep.subr.bf16.mxu0 %v1079_v1 }
 0x15e   :  { %1067 = vmatpush3.bf16.msra.mxu0 %v1066_v60 }
 0x15f   :  { %1068 = vmatprep.subr.bf16.mxu0 %v1079_v1 }
 0x162   :  { %1070 = vmatpush3.bf16.msra.mxu0 %v1069_v63 }
 0x1b3   :  { %v204_v35 = vpop.f32.mrb[0].mxu1 }
 0x1b4   :  { %v857_v36 = vpop.f32.mrb[1].mxu1  ;;  %v205_v9 = vadd.f32 %v692_v8, %v204_v35 }
 0x1b6   :  { %v208_v11 = vmax.f32 %v205_v9, 0.0 }
 0x1b7   :  { %v478_v38 = vpop.f32.mrb[2].mxu1 }
 0x1b8   :  { %v479_v39 = vadd.f32 %v720_v37, %v478_v38  ;;  %v906_v40 = vpop.f32.mrb[3].mxu1 }
 0x1ba   :  { %v482_v41 = vmax.f32 %v479_v39, 0.0 }
 0x1bc   :  { %940 = vmatmul.mubr.f32.vlgmr.msra.gmra.mrb[4].mxu1 %v482_v41 }
 0x220   :  { %v389_v50 = vpop.f32.mrb[4].mxu0 }
 0x221   :  { %v390_v52 = vadd.f32 %v716_v49, %v389_v50  ;;  %v899_v53 = vpop.f32.mrb[5].mxu0 }
 0x223   :  { %v393_v56 = vmax.f32 %v390_v52, 0.0 }
 0x225   :  { %580 = vrot.lane.b32.xlu1 %v393_v56, %s1085_s12 }
 0x28f   :  { %v574_v2 = vpop.f32.mrb[4].mxu1 }
 0x290   :  { %v575_v3 = vadd.f32 %v740_v0, %v574_v2  ;;  %v941_v4 = vpop.f32.mrb[5].mxu1 }
 0x292   :  { %v578_v7 = vmax.f32 %v575_v3, 0.0 }
 0x294   :  { %584 = vrot.lane.b32.xlu1 %v578_v7, %s1086_s21 }
 0x297   :  { %v581_v10 = vpop.permute.xlu1 %580 }
 0x298   :  { %v588_v1 = vsel %vm587_vm5, %v208_v11, %v581_v10 }
 0x306   :  { %v585_v5 = vpop.permute.xlu1 %584 }
 0x307   :  { %v590_v12 = vsel %vm589_vm6, %v588_v1, %v585_v5 }
 0x308   :  { %967 = vmatmul.mubr.msk.f32.vlgmr.msra.gmra.mrb[6].mxu0 %vm610_vm7, %v590_v12 }
 0x3db   :  { %v680_v14 = vpop.f32.mrb[6].mxu0 }
 0x3dc   :  { %v681_v15 = vadd.f32 %v741_v13, %v680_v14  ;;  %v968_v16 = vpop.f32.mrb[7].mxu0 }
 0x3de   :  { %684 = vst [vmem:[%s1419_s7] sm:$0xff] %v681_v15 }

</bundles_post_ra>
